<compile_context>
chip_gen: v7x
topology: tpu7x:2x2x1
jax: 0.10.0
libtpu: 0.0.40
codegen_flags: <defaults>
</compile_context>

<pallas_src>
import math

import numpy as np

import jax
import jax.numpy as jnp
from jax.experimental import pallas as pl
from jax.experimental.pallas import tpu as pltpu


# ----------------------------------------------------------------------------
# Static helpers (PyTorch adaptive-pool bin boundaries + packing tables)
# ----------------------------------------------------------------------------
def _adaptive_bins(h, w, s):
    """PyTorch AdaptiveMax/AvgPool2d bin boundaries, row-major (i, j) order."""
    def edges(n):
        return [((i * n) // s, ((i + 1) * n + s - 1) // s) for i in range(s)]
    hb, wb = edges(h), edges(w)
    return tuple((h0, h1, w0, w1) for (h0, h1) in hb for (w0, w1) in wb)


def _pool_tables(h, w, s):
    """Bin-major gather indices + avg weights.

    idx[p, l]  : flat H*W index of the l-th element of bin p.  Ragged bins are
                 padded with a duplicate of the bin's first element (harmless
                 for max, zero-weighted for avg).
    wavg[p, l] : 1/area_p for real elements, 0 for pads.
    """
    bins = _adaptive_bins(h, w, s)
    L = max((h1 - h0) * (w1 - w0) for (h0, h1, w0, w1) in bins)
    s2 = len(bins)
    idx = np.zeros((s2, L), np.int32)
    wavg = np.zeros((s2, L), np.float32)
    for p, (h0, h1, w0, w1) in enumerate(bins):
        flat = [i * w + j for i in range(h0, h1) for j in range(w0, w1)]
        area = len(flat)
        idx[p, :area] = flat
        idx[p, area:] = flat[0]
        wavg[p, :area] = 1.0 / float(area)
    return jnp.asarray(idx), jnp.asarray(wavg), L


# ----------------------------------------------------------------------------
# Pallas kernels
# ----------------------------------------------------------------------------
def _gate_kernel(x_ref, wavg_ref, qw1m_ref, qw1a_ref, qb1_ref, qw2_ref, qb2_ref,
                 kw1_ref, kb1_ref, kw2_ref, kb2_ref, o_ref):
    """Per-batch fused pool + q-MLP + k-path.  Writes (1 + k[b, :]) as (C, 1)."""
    xp = x_ref[0]                                        # (C, s^2, L)

    # Adaptive pooling: one max + one weighted sum over the packed bin axis.
    mx = jnp.max(xp, axis=-1)                            # (C, s^2)
    av = jnp.sum(xp * wavg_ref[...], axis=-1)            # (C, s^2)

    # First Linear of the q-MLP, max/avg halves folded in (== concat @ W1^T).
    q1 = jnp.maximum(
        jnp.dot(mx, qw1m_ref[...], preferred_element_type=jnp.float32)
        + jnp.dot(av, qw1a_ref[...], preferred_element_type=jnp.float32)
        + qb1_ref[...], 0.0)                             # (C, s^2//2); Dropout = id

    # Second Linear of the q-MLP -> per-channel scalar.
    q2 = jnp.dot(q1, qw2_ref[...],
                 preferred_element_type=jnp.float32) + qb2_ref[...]   # (C, 1)

    # k path: 1x1 conv -> ReLU -> (Dropout=id) -> 1x1 conv -> Sigmoid,
    # done as per-batch column-vector matmuls (no regroup matrix needed).
    k1 = jnp.maximum(
        jnp.dot(kw1_ref[...], q2, preferred_element_type=jnp.float32)
        + kb1_ref[...], 0.0)                             # (C/4, 1)
    k2 = jax.nn.sigmoid(
        jnp.dot(kw2_ref[...], k1, preferred_element_type=jnp.float32)
        + kb2_ref[...])                                  # (C, 1)

    # +1 folds the residual (k*x + x).
    o_ref[0] = k2 + 1.0


def _scale_kernel(x_ref, k_ref, o_ref):
    """out = x * (k + 1); (k+1) is a per-row scalar broadcast over the lanes."""
    o_ref[...] = x_ref[...] * k_ref[...]


# ----------------------------------------------------------------------------
# Tiling for the residual-scaling kernel
# ----------------------------------------------------------------------------
def _scale_tiles(bc, hw):
    # Column tile: full extent if modest, else a 128-multiple chunk.  Ragged
    # last blocks are fine (block_shape need not divide the array).
    tc = hw if hw <= 4096 else 4096
    # Row tile targeting ~8 MiB blocks: double-buffered in+out ~= 32 MiB,
    # inside v7x's 64 MiB VMEM and under the raised vmem limit (v5e/v6e have
    # 128 MiB physical, so larger-than-minimal blocks are safe there too).
    budget_elems = (8 << 20) // 4
    tr = max(8, (budget_elems // max(tc, 1)) // 8 * 8)
    tr = min(tr, 2048)
    if tr >= bc:
        tr = bc                      # full extent (always a legal block dim)
    return tr, tc


# ----------------------------------------------------------------------------
# Parameters (deterministic synthetic weights, PyTorch layouts)
# ----------------------------------------------------------------------------
def init_params(key, in_channels):
    size = int(math.log2(in_channels))     # matches the PyTorch module exactly
    s2 = size * size
    c4 = in_channels // 4
    ks = jax.random.split(key, 8)

    def w(k, shape, scale=0.1):
        return scale * jax.random.normal(k, shape, jnp.float32)

    return {
        # q = Linear(2*s^2 -> s^2//2), ReLU, Dropout, Linear(s^2//2 -> 1)
        "qW1": w(ks[0], (s2 // 2, 2 * s2)), "qb1": w(ks[1], (s2 // 2,)),
        "qW2": w(ks[2], (1, s2 // 2)),      "qb2": w(ks[3], (1,)),
        # k = Conv1x1(C -> C/4), ReLU, Dropout, Conv1x1(C/4 -> C), Sigmoid
        "kW1": w(ks[4], (c4, in_channels, 1, 1)), "kb1": w(ks[5], (c4,)),
        "kW2": w(ks[6], (in_channels, c4, 1, 1)), "kb2": w(ks[7], (in_channels,)),
    }


# ----------------------------------------------------------------------------
# Forward pass
# ----------------------------------------------------------------------------
def aca_forward(params, x_nchw):
    B, C, H, W = x_nchw.shape
    size = int(math.log2(C))               # same (truncating) rule as PyTorch
    s2 = size * size
    c4 = C // 4
    BC, HW = B * C, H * W

    xf = x_nchw.astype(jnp.float32)
    x2 = xf.reshape(BC, HW)                 # lane-dense residual layout

    # Bin-major packed pooling input (wrapper-side layout plumbing).
    idx, wavg, L = _pool_tables(H, W, size)
    x_packed = jnp.take(xf.reshape(B, C, HW), idx.reshape(-1), axis=2)
    x_packed = x_packed.reshape(B, C, s2, L)

    # Parameters in kernel-friendly layouts.
    qw1m = params["qW1"][:, :s2].T          # (s^2, s^2//2)   max half of W1^T
    qw1a = params["qW1"][:, s2:].T          # (s^2, s^2//2)   avg half of W1^T
    qb1 = params["qb1"].reshape(1, -1)
    qw2t = params["qW2"].T                  # (s^2//2, 1)
    qb2 = params["qb2"].reshape(1, 1)
    kw1 = params["kW1"].reshape(c4, C)      # (C/4, C)
    kb1 = params["kb1"].reshape(c4, 1)
    kw2 = params["kW2"].reshape(C, c4)      # (C, C/4)
    kb2 = params["kb2"].reshape(C, 1)

    def full(shape):
        return pl.BlockSpec(shape, lambda b, _n=len(shape): (0,) * _n)

    # ---- Call 1: per-batch gate kernel -> (1 + k) as (B, C, 1) --------------
    gate = pl.pallas_call(
        _gate_kernel,
        out_shape=jax.ShapeDtypeStruct((B, C, 1), jnp.float32),
        grid=(B,),
        in_specs=[
            pl.BlockSpec((1, C, s2, L), lambda b: (b, 0, 0, 0)),   # x_packed
            full((s2, L)),                                         # wavg
            full((s2, s2 // 2)), full((s2, s2 // 2)),              # qW1 halves
            full((1, s2 // 2)),                                    # qb1
            full((s2 // 2, 1)), full((1, 1)),                      # qW2, qb2
            full((c4, C)), full((c4, 1)),                          # kW1, kb1
            full((C, c4)), full((C, 1)),                           # kW2, kb2
        ],
        out_specs=pl.BlockSpec((1, C, 1), lambda b: (b, 0, 0)),
        compiler_params=pltpu.CompilerParams(
            dimension_semantics=("parallel",),
            vmem_limit_bytes=48 << 20),
    )(x_packed, wavg, qw1m, qw1a, qb1, qw2t, qb2, kw1, kb1, kw2, kb2)

    kp1 = gate.reshape(BC, 1)               # per-(b,c)-row scale (k + 1)

    # ---- Call 2: gridded, lane-dense residual scaling out = x * (k + 1) -----
    tr, tc = _scale_tiles(BC, HW)
    grid = (pl.cdiv(BC, tr), pl.cdiv(HW, tc))
    out2 = pl.pallas_call(
        _scale_kernel,
        out_shape=jax.ShapeDtypeStruct((BC, HW), jnp.float32),
        grid=grid,
        in_specs=[pl.BlockSpec((tr, tc), lambda i, j: (i, j)),
                  pl.BlockSpec((tr, 1), lambda i, j: (i, 0))],
        out_specs=pl.BlockSpec((tr, tc), lambda i, j: (i, j)),
        compiler_params=pltpu.CompilerParams(
            dimension_semantics=("parallel", "parallel"),
            vmem_limit_bytes=48 << 20),
        cost_estimate=pl.CostEstimate(
            flops=2 * BC * HW, transcendentals=0,
            bytes_accessed=(2 * BC * HW + BC) * 4),
    )(x2, kp1)

    return out2.reshape(B, C, H, W)


# ----------------------------------------------------------------------------
# Pure-JAX reference (for correctness check)
# ----------------------------------------------------------------------------
def aca_reference(params, x):
    B, C, H, W = x.shape
    size = int(math.log2(C))
    bins = _adaptive_bins(H, W, size)
    mx = jnp.stack([jnp.max(x[:, :, h0:h1, w0:w1], axis=(2, 3))
                    for (h0, h1, w0, w1) in bins], axis=2)        # (B, C, s^2)
    av = jnp.stack([jnp.mean(x[:, :, h0:h1, w0:w1], axis=(2, 3))
                    for (h0, h1, w0, w1) in bins], axis=2)        # (B, C, s^2)
    q = jnp.concatenate([mx, av], axis=2)                         # (B, C, 2*s^2)
    q = jnp.maximum(q @ params["qW1"].T + params["qb1"], 0.0)
    q = (q @ params["qW2"].T + params["qb2"])[..., 0]             # (B, C)
    k1 = jnp.maximum(q @ params["kW1"].reshape(C // 4, C).T + params["kb1"], 0.0)
    k2 = jax.nn.sigmoid(k1 @ params["kW2"].reshape(C, C // 4).T + params["kb2"])
    return x * (k2[:, :, None, None] + 1.0)


# ----------------------------------------------------------------------------
if __name__ == "__main__":
    key = jax.random.PRNGKey(0)
    B, C, H, W = 2, 16, 16, 16           # in_channels=16 -> size=4
    # p (Dropout prob) is irrelevant at inference: Dropout = identity.
    kx, kp = jax.random.split(key)
    x = jax.random.normal(kx, (B, C, H, W), jnp.float32)
    params = init_params(kp, C)

    fwd = jax.jit(aca_forward)
    out = jax.block_until_ready(fwd(params, x))

    assert out.shape == (B, C, H, W), out.shape
    assert bool(jnp.all(jnp.isfinite(out)))

    ref = aca_reference(params, x)
    err = float(jnp.max(jnp.abs(out - ref)))
    assert err < 1e-2, f"max abs err vs reference: {err}"

    print("KERNEL_OK")
</pallas_src>

<mosaic_0001>
module attributes {stable_mosaic.version = 11 : i64} {
  func.func @_gate_kernel(%arg0: i32, %arg1: memref<1x16x16x16xf32, #tpu.memory_space<vmem>>, %arg2: memref<16x16xf32, #tpu.memory_space<vmem>>, %arg3: memref<16x8xf32, #tpu.memory_space<vmem>>, %arg4: memref<16x8xf32, #tpu.memory_space<vmem>>, %arg5: memref<1x8xf32, #tpu.memory_space<vmem>>, %arg6: memref<8x1xf32, #tpu.memory_space<vmem>>, %arg7: memref<1x1xf32, #tpu.memory_space<vmem>>, %arg8: memref<4x16xf32, #tpu.memory_space<vmem>>, %arg9: memref<4x1xf32, #tpu.memory_space<vmem>>, %arg10: memref<16x4xf32, #tpu.memory_space<vmem>>, %arg11: memref<16x1xf32, #tpu.memory_space<vmem>>, %arg12: memref<1x16x1xf32, #tpu.memory_space<vmem>>) attributes {dimension_semantics = [#tpu.dimension_semantics<parallel>], iteration_bounds = array<i64: 2>, scalar_prefetch = 0 : i64, scratch_operands = 0 : i64, tpu.core_type = #tpu.core_type<tc>, window_params = [{transform_indices = @transform_0, window_bounds = array<i64: 1, 16, 16, 16>}, {pipeline_mode = #tpu.pipeline_mode<synchronous>, transform_indices = @transform_1, window_bounds = array<i64: 16, 16>}, {pipeline_mode = #tpu.pipeline_mode<synchronous>, transform_indices = @transform_2, window_bounds = array<i64: 16, 8>}, {pipeline_mode = #tpu.pipeline_mode<synchronous>, transform_indices = @transform_3, window_bounds = array<i64: 16, 8>}, {pipeline_mode = #tpu.pipeline_mode<synchronous>, transform_indices = @transform_4, window_bounds = array<i64: 1, 8>}, {pipeline_mode = #tpu.pipeline_mode<synchronous>, transform_indices = @transform_5, window_bounds = array<i64: 8, 1>}, {pipeline_mode = #tpu.pipeline_mode<synchronous>, transform_indices = @transform_6, window_bounds = array<i64: 1, 1>}, {pipeline_mode = #tpu.pipeline_mode<synchronous>, transform_indices = @transform_7, window_bounds = array<i64: 4, 16>}, {pipeline_mode = #tpu.pipeline_mode<synchronous>, transform_indices = @transform_8, window_bounds = array<i64: 4, 1>}, {pipeline_mode = #tpu.pipeline_mode<synchronous>, transform_indices = @transform_9, window_bounds = array<i64: 16, 4>}, {pipeline_mode = #tpu.pipeline_mode<synchronous>, transform_indices = @transform_10, window_bounds = array<i64: 16, 1>}, {transform_indices = @transform_11, window_bounds = array<i64: 1, 16, 1>}]} {
    %c0 = arith.constant 0 : index
    %c0_0 = arith.constant 0 : index
    %c0_1 = arith.constant 0 : index
    %c0_2 = arith.constant 0 : index
    %0 = vector.load %arg1[%c0, %c0_0, %c0_1, %c0_2] : memref<1x16x16x16xf32, #tpu.memory_space<vmem>>, vector<1x16x16x16xf32>
    %1 = vector.shape_cast %0 : vector<1x16x16x16xf32> to vector<16x16x16xf32>
    %cst = arith.constant dense<0xFF800000> : vector<16x16xf32>
    %2 = vector.multi_reduction <maximumf>, %1, %cst [2] : vector<16x16x16xf32> to vector<16x16xf32>
    %c0_3 = arith.constant 0 : index
    %c0_4 = arith.constant 0 : index
    %3 = vector.load %arg2[%c0_3, %c0_4] : memref<16x16xf32, #tpu.memory_space<vmem>>, vector<16x16xf32>
    %4 = vector.shape_cast %3 : vector<16x16xf32> to vector<1x16x16xf32>
    %5 = vector.broadcast %4 : vector<1x16x16xf32> to vector<16x16x16xf32>
    %6 = arith.mulf %1, %5 : vector<16x16x16xf32>
    %cst_5 = arith.constant dense<0.000000e+00> : vector<16x16xf32>
    %7 = vector.multi_reduction <add>, %6, %cst_5 [2] : vector<16x16x16xf32> to vector<16x16xf32>
    %c0_6 = arith.constant 0 : index
    %c0_7 = arith.constant 0 : index
    %8 = vector.load %arg3[%c0_6, %c0_7] : memref<16x8xf32, #tpu.memory_space<vmem>>, vector<16x8xf32>
    %cst_8 = arith.constant dense<0.000000e+00> : vector<16x8xf32>
    %9 = tpu.matmul %2, %8, %cst_8 {dimension_numbers = #tpu.dot_dimension_numbers<[1], [0], [0], [1], [0, 0, 1, 1], [], []>} : vector<16x16xf32>, vector<16x8xf32>, vector<16x8xf32> -> vector<16x8xf32>
    %c0_9 = arith.constant 0 : index
    %c0_10 = arith.constant 0 : index
    %10 = vector.load %arg4[%c0_9, %c0_10] : memref<16x8xf32, #tpu.memory_space<vmem>>, vector<16x8xf32>
    %cst_11 = arith.constant dense<0.000000e+00> : vector<16x8xf32>
    %11 = tpu.matmul %7, %10, %cst_11 {dimension_numbers = #tpu.dot_dimension_numbers<[1], [0], [0], [1], [0, 0, 1, 1], [], []>} : vector<16x16xf32>, vector<16x8xf32>, vector<16x8xf32> -> vector<16x8xf32>
    %12 = arith.addf %9, %11 : vector<16x8xf32>
    %c0_12 = arith.constant 0 : index
    %c0_13 = arith.constant 0 : index
    %13 = vector.load %arg5[%c0_12, %c0_13] : memref<1x8xf32, #tpu.memory_space<vmem>>, vector<1x8xf32>
    %14 = vector.broadcast %13 : vector<1x8xf32> to vector<16x8xf32>
    %15 = arith.addf %12, %14 : vector<16x8xf32>
    %cst_14 = arith.constant 0.000000e+00 : f32
    %16 = vector.broadcast %cst_14 : f32 to vector<16x8xf32>
    %17 = arith.maximumf %15, %16 : vector<16x8xf32>
    %c0_15 = arith.constant 0 : index
    %c0_16 = arith.constant 0 : index
    %18 = vector.load %arg6[%c0_15, %c0_16] : memref<8x1xf32, #tpu.memory_space<vmem>>, vector<8x1xf32>
    %cst_17 = arith.constant dense<0.000000e+00> : vector<16x1xf32>
    %19 = tpu.matmul %17, %18, %cst_17 {dimension_numbers = #tpu.dot_dimension_numbers<[1], [0], [0], [1], [0, 0, 1, 1], [], []>} : vector<16x8xf32>, vector<8x1xf32>, vector<16x1xf32> -> vector<16x1xf32>
    %c0_18 = arith.constant 0 : index
    %c0_19 = arith.constant 0 : index
    %20 = vector.load %arg7[%c0_18, %c0_19] : memref<1x1xf32, #tpu.memory_space<vmem>>, vector<1x1xf32>
    %21 = vector.broadcast %20 : vector<1x1xf32> to vector<16x1xf32>
    %22 = arith.addf %19, %21 : vector<16x1xf32>
    %c0_20 = arith.constant 0 : index
    %c0_21 = arith.constant 0 : index
    %23 = vector.load %arg8[%c0_20, %c0_21] : memref<4x16xf32, #tpu.memory_space<vmem>>, vector<4x16xf32>
    %cst_22 = arith.constant dense<0.000000e+00> : vector<4x1xf32>
    %24 = tpu.matmul %23, %22, %cst_22 {dimension_numbers = #tpu.dot_dimension_numbers<[1], [0], [0], [1], [0, 0, 1, 1], [], []>} : vector<4x16xf32>, vector<16x1xf32>, vector<4x1xf32> -> vector<4x1xf32>
    %c0_23 = arith.constant 0 : index
    %c0_24 = arith.constant 0 : index
    %25 = vector.load %arg9[%c0_23, %c0_24] : memref<4x1xf32, #tpu.memory_space<vmem>>, vector<4x1xf32>
    %26 = arith.addf %24, %25 : vector<4x1xf32>
    %cst_25 = arith.constant 0.000000e+00 : f32
    %27 = vector.broadcast %cst_25 : f32 to vector<4x1xf32>
    %28 = arith.maximumf %26, %27 : vector<4x1xf32>
    %c0_26 = arith.constant 0 : index
    %c0_27 = arith.constant 0 : index
    %29 = vector.load %arg10[%c0_26, %c0_27] : memref<16x4xf32, #tpu.memory_space<vmem>>, vector<16x4xf32>
    %cst_28 = arith.constant dense<0.000000e+00> : vector<16x1xf32>
    %30 = tpu.matmul %29, %28, %cst_28 {dimension_numbers = #tpu.dot_dimension_numbers<[1], [0], [0], [1], [0, 0, 1, 1], [], []>} : vector<16x4xf32>, vector<4x1xf32>, vector<16x1xf32> -> vector<16x1xf32>
    %c0_29 = arith.constant 0 : index
    %c0_30 = arith.constant 0 : index
    %31 = vector.load %arg11[%c0_29, %c0_30] : memref<16x1xf32, #tpu.memory_space<vmem>>, vector<16x1xf32>
    %32 = arith.addf %30, %31 : vector<16x1xf32>
    %33 = arith.negf %32 : vector<16x1xf32>
    %34 = math.exp %33 : vector<16x1xf32>
    %cst_31 = arith.constant 1.000000e+00 : f32
    %35 = vector.broadcast %cst_31 : f32 to vector<16x1xf32>
    %36 = arith.addf %35, %34 : vector<16x1xf32>
    %37 = arith.divf %35, %36 : vector<16x1xf32>
    %cst_32 = arith.constant 1.000000e+00 : f32
    %38 = vector.broadcast %cst_32 : f32 to vector<16x1xf32>
    %39 = arith.addf %37, %38 : vector<16x1xf32>
    %c0_33 = arith.constant 0 : index
    %c0_34 = arith.constant 0 : index
    %c0_35 = arith.constant 0 : index
    %40 = vector.load %arg12[%c0_33, %c0_34, %c0_35] : memref<1x16x1xf32, #tpu.memory_space<vmem>>, vector<1x16x1xf32>
    %41 = vector.shape_cast %40 : vector<1x16x1xf32> to vector<16x1xf32>
    %42 = vector.shape_cast %39 : vector<16x1xf32> to vector<1x16x1xf32>
    tpu.vector_store %arg12[%c0_33, %c0_34, %c0_35], %42 {strides = array<i32>} : memref<1x16x1xf32, #tpu.memory_space<vmem>>, vector<1x16x1xf32>,
    return
  }
  func.func @transform_0(%arg0: i32) -> (i32, i32, i32, i32) {
    %c0_i32 = arith.constant 0 : i32
    %c0_i32_0 = arith.constant 0 : i32
    %c0_i32_1 = arith.constant 0 : i32
    %c0_i32_2 = arith.constant 0 : i32
    return %arg0, %c0_i32, %c0_i32_0, %c0_i32_1 : i32, i32, i32, i32
  }
  func.func @transform_1(%arg0: i32) -> (i32, i32) {
    %c0_i32 = arith.constant 0 : i32
    %c0_i32_0 = arith.constant 0 : i32
    %c0_i32_1 = arith.constant 0 : i32
    return %c0_i32, %c0_i32_0 : i32, i32
  }
  func.func @transform_2(%arg0: i32) -> (i32, i32) {
    %c0_i32 = arith.constant 0 : i32
    %c0_i32_0 = arith.constant 0 : i32
    %c0_i32_1 = arith.constant 0 : i32
    return %c0_i32, %c0_i32_0 : i32, i32
  }
  func.func @transform_3(%arg0: i32) -> (i32, i32) {
    %c0_i32 = arith.constant 0 : i32
    %c0_i32_0 = arith.constant 0 : i32
    %c0_i32_1 = arith.constant 0 : i32
    return %c0_i32, %c0_i32_0 : i32, i32
  }
  func.func @transform_4(%arg0: i32) -> (i32, i32) {
    %c0_i32 = arith.constant 0 : i32
    %c0_i32_0 = arith.constant 0 : i32
    %c0_i32_1 = arith.constant 0 : i32
    return %c0_i32, %c0_i32_0 : i32, i32
  }
  func.func @transform_5(%arg0: i32) -> (i32, i32) {
    %c0_i32 = arith.constant 0 : i32
    %c0_i32_0 = arith.constant 0 : i32
    %c0_i32_1 = arith.constant 0 : i32
    return %c0_i32, %c0_i32_0 : i32, i32
  }
  func.func @transform_6(%arg0: i32) -> (i32, i32) {
    %c0_i32 = arith.constant 0 : i32
    %c0_i32_0 = arith.constant 0 : i32
    %c0_i32_1 = arith.constant 0 : i32
    return %c0_i32, %c0_i32_0 : i32, i32
  }
  func.func @transform_7(%arg0: i32) -> (i32, i32) {
    %c0_i32 = arith.constant 0 : i32
    %c0_i32_0 = arith.constant 0 : i32
    %c0_i32_1 = arith.constant 0 : i32
    return %c0_i32, %c0_i32_0 : i32, i32
  }
  func.func @transform_8(%arg0: i32) -> (i32, i32) {
    %c0_i32 = arith.constant 0 : i32
    %c0_i32_0 = arith.constant 0 : i32
    %c0_i32_1 = arith.constant 0 : i32
    return %c0_i32, %c0_i32_0 : i32, i32
  }
  func.func @transform_9(%arg0: i32) -> (i32, i32) {
    %c0_i32 = arith.constant 0 : i32
    %c0_i32_0 = arith.constant 0 : i32
    %c0_i32_1 = arith.constant 0 : i32
    return %c0_i32, %c0_i32_0 : i32, i32
  }
  func.func @transform_10(%arg0: i32) -> (i32, i32) {
    %c0_i32 = arith.constant 0 : i32
    %c0_i32_0 = arith.constant 0 : i32
    %c0_i32_1 = arith.constant 0 : i32
    return %c0_i32, %c0_i32_0 : i32, i32
  }
  func.func @transform_11(%arg0: i32) -> (i32, i32, i32) {
    %c0_i32 = arith.constant 0 : i32
    %c0_i32_0 = arith.constant 0 : i32
    %c0_i32_1 = arith.constant 0 : i32
    return %arg0, %c0_i32, %c0_i32_0 : i32, i32, i32
  }
}

module attributes {stable_mosaic.version = 11 : i64} {
  func.func @_scale_kernel(%arg0: i32, %arg1: i32, %arg2: memref<32x256xf32, #tpu.memory_space<vmem>>, %arg3: memref<32x1xf32, #tpu.memory_space<vmem>>, %arg4: memref<32x256xf32, #tpu.memory_space<vmem>>) attributes {dimension_semantics = [#tpu.dimension_semantics<parallel>, #tpu.dimension_semantics<parallel>], iteration_bounds = array<i64: 1, 1>, scalar_prefetch = 0 : i64, scratch_operands = 0 : i64, tpu.core_type = #tpu.core_type<tc>, window_params = [{transform_indices = @transform_0, window_bounds = array<i64: 32, 256>}, {transform_indices = @transform_1, window_bounds = array<i64: 32, 1>}, {transform_indices = @transform_2, window_bounds = array<i64: 32, 256>}]} {
    %c0 = arith.constant 0 : index
    %c0_0 = arith.constant 0 : index
    %0 = vector.load %arg2[%c0, %c0_0] : memref<32x256xf32, #tpu.memory_space<vmem>>, vector<32x256xf32>
    %c0_1 = arith.constant 0 : index
    %c0_2 = arith.constant 0 : index
    %1 = vector.load %arg3[%c0_1, %c0_2] : memref<32x1xf32, #tpu.memory_space<vmem>>, vector<32x1xf32>
    %2 = vector.broadcast %1 : vector<32x1xf32> to vector<32x256xf32>
    %3 = arith.mulf %0, %2 : vector<32x256xf32>
    %c0_3 = arith.constant 0 : index
    %c0_4 = arith.constant 0 : index
    %4 = vector.load %arg4[%c0_3, %c0_4] : memref<32x256xf32, #tpu.memory_space<vmem>>, vector<32x256xf32>
    tpu.vector_store %arg4[%c0_3, %c0_4], %3 {strides = array<i32>} : memref<32x256xf32, #tpu.memory_space<vmem>>, vector<32x256xf32>,
    return
  }
  func.func @transform_0(%arg0: i32, %arg1: i32) -> (i32, i32) {
    %c0_i32 = arith.constant 0 : i32
    return %arg0, %arg1 : i32, i32
  }
  func.func @transform_1(%arg0: i32, %arg1: i32) -> (i32, i32) {
    %c0_i32 = arith.constant 0 : i32
    %c0_i32_0 = arith.constant 0 : i32
    return %arg0, %c0_i32 : i32, i32
  }
  func.func @transform_2(%arg0: i32, %arg1: i32) -> (i32, i32) {
    %c0_i32 = arith.constant 0 : i32
    return %arg0, %arg1 : i32, i32
  }
}

</mosaic_0001>

<bundles_post_ra>
// kernel: aca_forward.3
= control target key start
LH: loop header
LB: loop body
LE: loop exit
PB: predicated region body
PF: predicated region fallthrough
CT: control target
= control target key end

     0   :  { %v66_v0 = vmov 0   ;;  %s142_s1 = inlined_call_operand.vmem [shape: f32[32,1], index: 1, kind: input, shape index: {}]   ;;  %s143_s0 = inlined_call_operand.vmem [shape: f32[32,256], index: 0, kind: input, shape index: {}]   ;;  %s144_s2 = inlined_call_operand.vmem [shape: f32[32,256], index: 2, kind: output, shape index: {}]  }
   0x1   :  { %65 = vset.pattern.permute.xlu1 %v66_v0  ;;  %64 = vset.pattern.permute.xlu0 %v66_v0  ;;  %v21_v1 = vld [vmem:[%s142_s1 + $0x10] sm:$0xff]  ;;  %v19_v2 = vld [vmem:[%s142_s1] sm:$0xff]  ;;  %v22_v3 = vld [vmem:[%s142_s1 + $0x18] sm:$0xff] }
   0x2   :  { %35 = vperm.xlu1 %65, %v21_v1   ;;  %25 = vperm.xlu0 %64, %v19_v2   ;;  %v20_v4 = vld [vmem:[%s142_s1 + $0x8] sm:$0xff]  ;;  %v15_v5 = vld [vmem:[%s143_s0 + $0x20] sm:$0xff]  ;;  %v17_v15 = vld [vmem:[%s143_s0 + $0x30] sm:$0xff] }
   0x3   :  { %v16_v6 = vld [vmem:[%s143_s0 + $0x28] sm:$0xff]  ;;  %v11_v7 = vld [vmem:[%s143_s0] sm:$0xff]  ;;  %v18_v16 = vld [vmem:[%s143_s0 + $0x38] sm:$0xff] }
   0x4   :  { %v12_v8 = vld [vmem:[%s143_s0 + $0x8] sm:$0xff]  ;;  %v13_v17 = vld [vmem:[%s143_s0 + $0x10] sm:$0xff]  ;;  %v14_v18 = vld [vmem:[%s143_s0 + $0x18] sm:$0xff] }
   0x6   :  { %40 = vperm.xlu1 %65, %v22_v3   ;;  %30 = vperm.xlu0 %64, %v20_v4  }
  0x81   :  { %v36_v9 = vpop.permute.xlu1 %35  ;;  %v26_v10 = vpop.permute.xlu0 %25 }
  0x82   :  { %v47_v11 = vmul.f32 %v36_v9, %v15_v5  ;;  %v48_v12 = vmul.f32 %v36_v9, %v16_v6  ;;  %v43_v13 = vmul.f32 %v26_v10, %v11_v7  ;;  %v44_v14 = vmul.f32 %v26_v10, %v12_v8 }
  0x84   :  { %55 = vst [vmem:[%s144_s2 + $0x20] sm:$0xff] %v47_v11  ;;  %56 = vst [vmem:[%s144_s2 + $0x28] sm:$0xff] %v48_v12 }
  0x85   :  { %51 = vst [vmem:[%s144_s2] sm:$0xff] %v43_v13  ;;  %52 = vst [vmem:[%s144_s2 + $0x8] sm:$0xff] %v44_v14  ;;  %v41_v19 = vpop.permute.xlu1 %40  ;;  %v31_v20 = vpop.permute.xlu0 %30 }
  0x86   :  { %v49_v21 = vmul.f32 %v41_v19, %v17_v15  ;;  %v50_v22 = vmul.f32 %v41_v19, %v18_v16  ;;  %v45_v23 = vmul.f32 %v31_v20, %v13_v17  ;;  %v46_v24 = vmul.f32 %v31_v20, %v14_v18 }
  0x88   :  { %57 = vst [vmem:[%s144_s2 + $0x30] sm:$0xff] %v49_v21  ;;  %58 = vst [vmem:[%s144_s2 + $0x38] sm:$0xff] %v50_v22 }
  0x89   :  { %53 = vst [vmem:[%s144_s2 + $0x10] sm:$0xff] %v45_v23  ;;  %54 = vst [vmem:[%s144_s2 + $0x18] sm:$0xff] %v46_v24 }

// kernel: aca_forward.2
= control target key start
LH: loop header
LB: loop body
LE: loop exit
PB: predicated region body
PF: predicated region fallthrough
CT: control target
= control target key end

     0   :  { %s1721_s19 = smov 0   ;;  %s2222_s0 = inlined_call_operand.vmem [shape: f32[2,16,16,16], index: 0, kind: input, shape index: {}]   ;;  %s2223_s1 = inlined_call_operand.vmem [shape: f32[16,16], index: 1, kind: input, shape index: {}]   ;;  %s2224_s2 = inlined_call_operand.vmem [shape: f32[16,8], index: 2, kind: input, shape index: {}]   ;;  %s2225_s3 = inlined_call_operand.vmem [shape: f32[16,8], index: 3, kind: input, shape index: {}]   ;;  %s2226_s4 = inlined_call_operand.vmem [shape: f32[1,8], index: 4, kind: input, shape index: {}]   ;;  %s2227_s5 = inlined_call_operand.vmem [shape: f32[8,1], index: 5, kind: input, shape index: {}]   ;;  %s2228_s6 = inlined_call_operand.<no memory space> [shape: f32[1,1], index: 6, kind: input, shape index: {}]   ;;  %s2229_s7 = inlined_call_operand.vmem [shape: f32[4,16], index: 7, kind: input, shape index: {}]   ;;  %s2230_s8 = inlined_call_operand.vmem [shape: f32[4,1], index: 8, kind: input, shape index: {}]   ;;  %s2231_s9 = inlined_call_operand.vmem [shape: f32[16,4], index: 9, kind: input, shape index: {}]   ;;  %s2232_s10 = inlined_call_operand.vmem [shape: f32[16,1], index: 10, kind: input, shape index: {}]   ;;  %s2233_s11 = inlined_call_operand.vmem [shape: f32[2,16,1], index: 11, kind: output, shape index: {}]  }
   0x1   :  { %v16_v0 = vstv %s2228_s6 }
   0x2   :  { %17 = vst [vmem:[#allocation2] sm:$0x1] %v16_v0 }
   0x3 LB: > { %s1540_s20 = sadd.s32 4294967295, %s1653_s19   ;;  %p1544_p0 = scmp.ge.s32.totalorder %s1653_s19, 1  ;;  %s1653_s19 = sphi %s1721_s19, %s23_s19  }
   0x4   : > { %p339_p1 = scmp.lt.s32.totalorder %s1653_s19, 3 }
   0x6   : > { %p340_p2 = pnand %p1544_p0, %p339_p1 }
   0x7   : > { %p379_p3 = scmp.lt.s32.totalorder (!%p340_p2), %s1540_s20, 1  ;;  %v1735_v1 = vld [vmem:[%s2223_s1] sm:$0xff] (!%p340_p2)  ;;  %v1740_v2 = vld [vmem:[%s2223_s1 + $0x8] sm:$0xff] (!%p340_p2)  ;;  %vm421_vm0 = vcmask (!%p340_p2), 130048   ;;  %vm695_vm1 = vcmask (!%p340_p2), 130112   ;;  %vm832_vm2 = vcmask (!%p340_p2), 1041409  }
   0x8   : > { %343 = sbr.rel (%p340_p2) target bundleno = 1192 (0x4a8), region = 64  ;;  %vm834_vm3 = vcmask (!%p340_p2), 1042434   ;;  %vm836_vm4 = vcmask (!%p340_p2), 1043459   ;;  %vm838_vm5 = vcmask (!%p340_p2), 1044484   ;;  %vm840_vm6 = vcmask (!%p340_p2), 1045509  }
   0x9   : > { %vm842_vm7 = vcmask (!%p340_p2), 1046534   ;;  %vm844_vm8 = vcmask (!%p340_p2), 1047559   ;;  %vm1220_vm9 = vcmask (!%p340_p2), 64512   ;;  %vm1656_vm10 = vmmov (!%p340_p2), 0  }
   0xa   : > { %vm1382_vm11 = vcmask (!%p340_p2), 31744   ;;  %vm1389_vm12 = vcmask (!%p340_p2), 1043456   ;;  %vm1482_vm13 = vcmask (!%p340_p2), 7168  }
   0xf   : > { %s2235_s20 = smov (!%p379_p3, %s1540_s20), 1 }
  0x10   : > { %s1565_s6 = sshll.u32 %s2235_s20, 8  ;;  %s1566_s15 = sshll.u32 %s2235_s20, 4 }
  0x11   : > { %s1745_s27 = scalar_lea.vmem %s2222_s0, %s1565_s6  ;;  %s388_s18 = scalar_lea.vmem %s2233_s11, %s1566_s15 }
  0x12   : > { %v1748_v3 = vld [vmem:[%s1745_s27 + $0x10] sm:$0xff]  ;;  %v1751_v4 = vld [vmem:[%s1745_s27] sm:$0xff]  ;;  %v1754_v5 = vld [vmem:[%s1745_s27 + $0x18] sm:$0xff] }
  0x13   : > { %v522_v6 = vmul.f32 %v1735_v1, %v1748_v3  ;;  %v520_v7 = vmul.f32 %v1735_v1, %v1751_v4  ;;  %v523_v8 = vmul.f32 %v1740_v2, %v1754_v5  ;;  %v1763_v9 = vld [vmem:[%s1745_s27 + $0x8] sm:$0xff]  ;;  %v1771_v12 = vld [vmem:[%s1745_s27 + $0x20] sm:$0xff]  ;;  %v1794_v25 = vld [vmem:[%s1745_s27 + $0x98] sm:$0xff] }
  0x14   : > { %v521_v10 = vmul.f32 %v1740_v2, %v1763_v9  ;;  %v1768_v11 = vld [vmem:[%s1745_s27 + $0x28] sm:$0xff]  ;;  %v524_v18 = vmul.f32 %v1735_v1, %v1771_v12  ;;  %v1785_v20 = vld [vmem:[%s1745_s27 + $0x80] sm:$0xff]  ;;  %v1797_v26 = vld [vmem:[%s1745_s27 + $0x90] sm:$0xff]  ;;  %v539_v29 = vmul.f32 %v1740_v2, %v1794_v25 }
  0x15   : > { %v558_v13 = vsel %vm421_vm0, %v522_v6, 0.0  ;;  %v552_v14 = vsel %vm421_vm0, %v520_v7, 0.0  ;;  %v561_v15 = vsel %vm421_vm0, %v523_v8, 0.0  ;;  %v525_v17 = vmul.f32 %v1740_v2, %v1768_v11  ;;  %v1782_v19 = vld [vmem:[%s1745_s27 + $0x88] sm:$0xff]  ;;  %v1806_v31 = vld [vmem:[%s1745_s27 + $0x38] sm:$0xff]  ;;  %v1809_v32 = vld [vmem:[%s1745_s27 + $0x30] sm:$0xff] }
  0x16   : > { %559 = vadd.xlane.f32.xlu1 %v558_v13  ;;  %553 = vadd.xlane.f32.xlu0 %v552_v14  ;;  %v555_v16 = vsel %vm421_vm0, %v521_v10, 0.0  ;;  %v564_v22 = vsel %vm421_vm0, %v524_v18, 0.0  ;;  %v537_v23 = vmul.f32 %v1740_v2, %v1782_v19  ;;  %v536_v24 = vmul.f32 %v1735_v1, %v1785_v20  ;;  %v1818_v37 = vld [vmem:[%s1745_s27 + $0xa8] sm:$0xff]  ;;  %v1821_v38 = vld [vmem:[%s1745_s27 + $0xa0] sm:$0xff]  ;;  %v1842_v49 = vld [vmem:[%s1745_s27 + $0xb8] sm:$0xff] }
  0x17   : > { %v567_v21 = vsel %vm421_vm0, %v525_v17, 0.0  ;;  %v538_v30 = vmul.f32 %v1735_v1, %v1797_v26  ;;  %v609_v33 = vsel %vm421_vm0, %v539_v29, 0.0  ;;  %v527_v35 = vmul.f32 %v1740_v2, %v1806_v31  ;;  %v1830_v43 = vld [vmem:[%s1745_s27 + $0x48] sm:$0xff]  ;;  %v1833_v44 = vld [vmem:[%s1745_s27 + $0x40] sm:$0xff]  ;;  %v1845_v50 = vld [vmem:[%s1745_s27 + $0xb0] sm:$0xff] }
  0x18   : > { %v603_v27 = vsel %vm421_vm0, %v537_v23, 0.0  ;;  %v600_v28 = vsel %vm421_vm0, %v536_v24, 0.0  ;;  %v526_v36 = vmul.f32 %v1735_v1, %v1809_v32  ;;  %v541_v41 = vmul.f32 %v1740_v2, %v1818_v37  ;;  %v1854_v55 = vld [vmem:[%s1745_s27 + $0x58] sm:$0xff]  ;;  %v1857_v56 = vld [vmem:[%s1745_s27 + $0x50] sm:$0xff]  ;;  %v1866_v61 = vld [vmem:[%s1745_s27 + $0xc8] sm:$0xff] }
  0x19   : > { %v606_v34 = vsel %vm421_vm0, %v538_v30, 0.0  ;;  %v573_v39 = vsel %vm421_vm0, %v527_v35, 0.0  ;;  %v540_v42 = vmul.f32 %v1735_v1, %v1821_v38  ;;  %v529_v47 = vmul.f32 %v1740_v2, %v1830_v43  ;;  %v1869_v62 = vld [vmem:[%s1745_s27 + $0xc0] sm:$0xff]  ;;  %v1878_v8 = vld [vmem:[%s1745_s27 + $0x68] sm:$0xff]  ;;  %v1890_v17 = vld [vmem:[%s1745_s27 + $0xd8] sm:$0xff] }
  0x1a   : > { %562 = vadd.xlane.f32.xlu1 %v561_v15  ;;  %556 = vadd.xlane.f32.xlu0 %v555_v16  ;;  %v570_v40 = vsel %vm421_vm0, %v526_v36, 0.0  ;;  %v615_v45 = vsel %vm421_vm0, %v541_v41, 0.0  ;;  %v528_v48 = vmul.f32 %v1735_v1, %v1833_v44  ;;  %v543_v53 = vmul.f32 %v1740_v2, %v1842_v49  ;;  %v1881_v10 = vld [vmem:[%s1745_s27 + $0x60] sm:$0xff]  ;;  %v1893_v18 = vld [vmem:[%s1745_s27 + $0xd0] sm:$0xff]  ;;  %v1914_v35 = vld [vmem:[%s1745_s27 + $0xe8] sm:$0xff] }
  0x1b   : > { %v612_v46 = vsel %vm421_vm0, %v540_v42, 0.0  ;;  %v579_v51 = vsel %vm421_vm0, %v529_v47, 0.0  ;;  %v542_v54 = vmul.f32 %v1735_v1, %v1845_v50  ;;  %v531_v59 = vmul.f32 %v1740_v2, %v1854_v55  ;;  %v1917_v36 = vld [vmem:[%s1745_s27 + $0xe0] sm:$0xff] }
  0x1c   : > { %v576_v52 = vsel %vm421_vm0, %v528_v48, 0.0  ;;  %v621_v57 = vsel %vm421_vm0, %v543_v53, 0.0  ;;  %v530_v60 = vmul.f32 %v1735_v1, %v1857_v56  ;;  %v545_v6 = vmul.f32 %v1740_v2, %v1866_v61 }
  0x1d   : > { %v618_v58 = vsel %vm421_vm0, %v542_v54, 0.0  ;;  %v585_v63 = vsel %vm421_vm0, %v531_v59, 0.0  ;;  %v544_v7 = vmul.f32 %v1735_v1, %v1869_v62  ;;  %v533_v15 = vmul.f32 %v1740_v2, %v1878_v8 }
  0x1e   : > { %568 = vadd.xlane.f32.xlu1 %v567_v21  ;;  %565 = vadd.xlane.f32.xlu0 %v564_v22  ;;  %v582_v0 = vsel %vm421_vm0, %v530_v60, 0.0  ;;  %v627_v13 = vsel %vm421_vm0, %v545_v6, 0.0  ;;  %v532_v16 = vmul.f32 %v1735_v1, %v1881_v10  ;;  %v547_v23 = vmul.f32 %v1740_v2, %v1890_v17 }
  0x1f   : > { %v624_v14 = vsel %vm421_vm0, %v544_v7, 0.0  ;;  %v591_v21 = vsel %vm421_vm0, %v533_v15, 0.0  ;;  %v546_v24 = vmul.f32 %v1735_v1, %v1893_v18  ;;  %v549_v41 = vmul.f32 %v1740_v2, %v1914_v35  ;;  %v649_v15 = vld [vmem:[%s2224_s2 + $0x8] sm:$0xff] }
  0x20   : > { %v588_v22 = vsel %vm421_vm0, %v532_v16, 0.0  ;;  %v633_v29 = vsel %vm421_vm0, %v547_v23, 0.0  ;;  %v548_v42 = vmul.f32 %v1735_v1, %v1917_v36  ;;  %v437_v59 = vsel %vm421_vm0, %v1768_v11, -inf }
  0x21   : > { %v630_v30 = vsel %vm421_vm0, %v546_v24, 0.0  ;;  %v639_v47 = vsel %vm421_vm0, %v549_v41, 0.0  ;;  %v434_v60 = vsel %vm421_vm0, %v1771_v12, -inf  ;;  %v470_v11 = vsel %vm421_vm0, %v1785_v20, -inf }
  0x22   : > { %604 = vadd.xlane.f32.xlu1 %v603_v27  ;;  %601 = vadd.xlane.f32.xlu0 %v600_v28  ;;  %v1902_v27 = vld [vmem:[%s1745_s27 + $0x78] sm:$0xff]  ;;  %v1905_v28 = vld [vmem:[%s1745_s27 + $0x70] sm:$0xff]  ;;  %v636_v48 = vsel %vm421_vm0, %v548_v42, 0.0  ;;  %v479_v12 = vsel %vm421_vm0, %v1794_v25, -inf  ;;  %v485_v20 = vsel %vm421_vm0, %v1818_v37, -inf  ;;  %v482_v6 = vsel %vm421_vm0, %v1821_v38, -inf }
  0x23   : > { %v449_v25 = vsel %vm421_vm0, %v1830_v43, -inf  ;;  %v455_v37 = vsel %vm421_vm0, %v1854_v55, -inf  ;;  %v452_v38 = vsel %vm421_vm0, %v1857_v56, -inf  ;;  %v497_v43 = vsel %vm421_vm0, %v1866_v61, -inf }
  0x24   : > { %v503_v55 = vsel %vm421_vm0, %v1890_v17, -inf  ;;  %v500_v56 = vsel %vm421_vm0, %v1893_v18, -inf  ;;  %v467_v61 = vsel %vm421_vm0, %v1902_v27, -inf  ;;  %v509_v7 = vsel %vm421_vm0, %v1914_v35, -inf }
  0x26   : > { %610 = vadd.xlane.f32.xlu1 %v609_v33  ;;  %607 = vadd.xlane.f32.xlu0 %v606_v34  ;;  %v535_v33 = vmul.f32 %v1740_v2, %v1902_v27  ;;  %v534_v34 = vmul.f32 %v1735_v1, %v1905_v28 }
  0x2a   : > { %574 = vadd.xlane.f32.xlu1 %v573_v39  ;;  %571 = vadd.xlane.f32.xlu0 %v570_v40  ;;  %v597_v39 = vsel %vm421_vm0, %v535_v33, 0.0  ;;  %v594_v40 = vsel %vm421_vm0, %v534_v34, 0.0 }
  0x2e   : > { %616 = vadd.xlane.f32.xlu1 %v615_v45  ;;  %613 = vadd.xlane.f32.xlu0 %v612_v46  ;;  %v1926_v45 = vld [vmem:[%s1745_s27 + $0xf8] sm:$0xff]  ;;  %v1929_v46 = vld [vmem:[%s1745_s27 + $0xf0] sm:$0xff] }
  0x32   : > { %580 = vadd.xlane.f32.xlu1 %v579_v51  ;;  %577 = vadd.xlane.f32.xlu0 %v576_v52  ;;  %v551_v51 = vmul.f32 %v1740_v2, %v1926_v45  ;;  %v550_v52 = vmul.f32 %v1735_v1, %v1929_v46  ;;  %v431_v2 = vsel %vm421_vm0, %v1754_v5, -inf  ;;  %v428_v1 = vsel %vm421_vm0, %v1748_v3, -inf }
  0x33   : > { %v473_v3 = vsel %vm421_vm0, %v1782_v19, -inf  ;;  %v440_v19 = vsel %vm421_vm0, %v1809_v32, -inf  ;;  %v488_v32 = vsel %vm421_vm0, %v1845_v50, -inf  ;;  %v458_v50 = vsel %vm421_vm0, %v1881_v10, -inf }
  0x34   : > { %v645_v53 = vsel %vm421_vm0, %v551_v51, 0.0  ;;  %v642_v54 = vsel %vm421_vm0, %v550_v52, 0.0  ;;  %v515_v10 = vsel %vm421_vm0, %v1926_v45, -inf }
  0x36   : > { %622 = vadd.xlane.f32.xlu1 %v621_v57  ;;  %619 = vadd.xlane.f32.xlu0 %v618_v58  ;;  %v425_v57 = vsel %vm421_vm0, %v1763_v9, -inf  ;;  %v422_v58 = vsel %vm421_vm0, %v1751_v4, -inf  ;;  %v650_v4 = vld [vmem:[%s2225_s3] sm:$0xff]  ;;  %v651_v9 = vld [vmem:[%s2225_s3 + $0x8] sm:$0xff] }
  0x37   : > { %v1615_v5 = vpack.c.bf16 %v651_v9, %v650_v4 }
  0x39   : > { %1616 = vmatprep.subr.bf16.mxu0 %v1615_v5 }
  0x3a   : > { %586 = vadd.xlane.f32.xlu1 %v585_v63  ;;  %583 = vadd.xlane.f32.xlu0 %v582_v0  ;;  %v476_v63 = vsel %vm421_vm0, %v1797_v26, -inf  ;;  %v443_v0 = vsel %vm421_vm0, %v1806_v31, -inf  ;;  %v446_v26 = vsel %vm421_vm0, %v1833_v44, -inf  ;;  %v491_v31 = vsel %vm421_vm0, %v1842_v49, -inf }
  0x3b   : > { %1618 = vmatpush3.bf16.msra.mxu0 %v1615_v5  ;;  %v494_v44 = vsel %vm421_vm0, %v1869_v62, -inf  ;;  %v461_v49 = vsel %vm421_vm0, %v1878_v8, -inf  ;;  %v464_v62 = vsel %vm421_vm0, %v1905_v28, -inf  ;;  %v506_v8 = vsel %vm421_vm0, %v1917_v36, -inf }
  0x3e   : > { %628 = vadd.xlane.f32.xlu1 %v627_v13  ;;  %625 = vadd.xlane.f32.xlu0 %v624_v14  ;;  %v512_v13 = vsel %vm421_vm0, %v1929_v46, -inf  ;;  %v648_v14 = vld [vmem:[%s2224_s2] sm:$0xff] }
  0x3f   : > { %v2015_v16 = vpack.c.bf16 %v649_v15, %v648_v14 }
  0x41   : > { %1620 = vmatprep.subr.bf16.mxu0 %v2015_v16 }
  0x42   : > { %592 = vadd.xlane.f32.xlu1 %v591_v21  ;;  %589 = vadd.xlane.f32.xlu0 %v588_v22 }
  0x46   : > { %634 = vadd.xlane.f32.xlu1 %v633_v29  ;;  %631 = vadd.xlane.f32.xlu0 %v630_v30 }
  0x4a   : > { %598 = vadd.xlane.f32.xlu1 %v597_v39  ;;  %595 = vadd.xlane.f32.xlu0 %v594_v40  ;;  %v684_v39 = vlaneseq }
  0x4c   : > { %v685_v42 = vand.u32 127, %v684_v39 }
  0x4e   : > { %640 = vadd.xlane.f32.xlu1 %v639_v47  ;;  %637 = vadd.xlane.f32.xlu0 %v636_v48  ;;  %v690_v47 = vadd.s32 4294967288, %v685_v42  ;;  %v687_v48 = vshrl.u32 %v684_v39, 7 }
  0x52   : > { %646 = vadd.xlane.f32.xlu1 %v645_v53  ;;  %643 = vadd.xlane.f32.xlu0 %v642_v54  ;;  %v2034_v53 = vsub.s32 %v690_v47, %v687_v48  ;;  %v2036_v54 = vsub.s32 %v685_v42, %v687_v48 }
  0x56   : > { %426 = vmax.xlane.f32.xlu1 %v425_v57  ;;  %423 = vmax.xlane.f32.xlu0 %v422_v58 }
  0x5a   : > { %432 = vmax.xlane.f32.xlu1 %v431_v2  ;;  %429 = vmax.xlane.f32.xlu0 %v428_v1 }
  0x5e   : > { %438 = vmax.xlane.f32.xlu1 %v437_v59  ;;  %435 = vmax.xlane.f32.xlu0 %v434_v60 }
  0x62   : > { %474 = vmax.xlane.f32.xlu1 %v473_v3  ;;  %471 = vmax.xlane.f32.xlu0 %v470_v11 }
  0x66   : > { %480 = vmax.xlane.f32.xlu1 %v479_v12  ;;  %477 = vmax.xlane.f32.xlu0 %v476_v63 }
  0x6a   : > { %444 = vmax.xlane.f32.xlu1 %v443_v0  ;;  %441 = vmax.xlane.f32.xlu0 %v440_v19 }
  0x6e   : > { %486 = vmax.xlane.f32.xlu1 %v485_v20  ;;  %483 = vmax.xlane.f32.xlu0 %v482_v6 }
  0x72   : > { %450 = vmax.xlane.f32.xlu1 %v449_v25  ;;  %447 = vmax.xlane.f32.xlu0 %v446_v26 }
  0x76   : > { %492 = vmax.xlane.f32.xlu1 %v491_v31  ;;  %489 = vmax.xlane.f32.xlu0 %v488_v32 }
  0x7a   : > { %456 = vmax.xlane.f32.xlu1 %v455_v37  ;;  %453 = vmax.xlane.f32.xlu0 %v452_v38 }
  0x7e   : > { %498 = vmax.xlane.f32.xlu1 %v497_v43  ;;  %495 = vmax.xlane.f32.xlu0 %v494_v44 }
  0x82   : > { %462 = vmax.xlane.f32.xlu1 %v461_v49  ;;  %459 = vmax.xlane.f32.xlu0 %v458_v50 }
  0x86   : > { %504 = vmax.xlane.f32.xlu1 %v503_v55  ;;  %501 = vmax.xlane.f32.xlu0 %v500_v56 }
  0x8a   : > { %468 = vmax.xlane.f32.xlu1 %v467_v61  ;;  %465 = vmax.xlane.f32.xlu0 %v464_v62 }
  0x8e   : > { %510 = vmax.xlane.f32.xlu1 %v509_v7  ;;  %507 = vmax.xlane.f32.xlu0 %v506_v8 }
  0x92   : > { %516 = vmax.xlane.f32.xlu1 %v515_v10  ;;  %513 = vmax.xlane.f32.xlu0 %v512_v13 }
  0xa3   : > { %v560_v17 = vpop.xlane.xlu1 %559  ;;  %v554_v18 = vpop.xlane.xlu0 %553 }
  0xa4   : > { %v700_v4 = vrot.slane %v560_v17, %v2036_v54  ;;  %v689_v9 = vrot.slane %v554_v18, %v2036_v54 }
  0xa7   : > { %v563_v21 = vpop.xlane.xlu1 %562  ;;  %v557_v22 = vpop.xlane.xlu0 %556 }
  0xa8   : > { %v704_v2 = vrot.slane %v563_v21, %v2034_v53  ;;  %v694_v1 = vrot.slane %v557_v22, %v2034_v53 }
  0xaa   : > { %v705_v19 = vsel %vm695_vm1, %v704_v2, %v700_v4  ;;  %v696_v20 = vsel %vm695_vm1, %v694_v1, %v689_v9 }
  0xab   : > { %v569_v23 = vpop.xlane.xlu1 %568  ;;  %v566_v24 = vpop.xlane.xlu0 %565  ;;  %v833_v44 = vsel %vm832_vm2, %v705_v19, %v696_v20 }
  0xac   : > { %v713_v59 = vrot.slane %v569_v23, %v2034_v53  ;;  %v709_v60 = vrot.slane %v566_v24, %v2036_v54 }
  0xae   : > { %v714_v6 = vsel %vm695_vm1, %v713_v59, %v709_v60 }
  0xaf   : > { %v2018_v27 = vpop.xlane.xlu1 %604  ;;  %v2020_v28 = vpop.xlane.xlu0 %601  ;;  %v835_v50 = vsel %vm834_vm3, %v714_v6, %v833_v44 }
  0xb0   : > { %v767_v61 = vrot.slane %v2018_v27, %v2034_v53  ;;  %v763_v62 = vrot.slane %v2020_v28, %v2036_v54 }
  0xb3   : > { %v2022_v29 = vpop.xlane.xlu1 %610  ;;  %v2024_v30 = vpop.xlane.xlu0 %607 }
  0xb4   : > { %v776_v55 = vrot.slane %v2022_v29, %v2034_v53  ;;  %v772_v56 = vrot.slane %v2024_v30, %v2036_v54 }
  0xb6   : > { %v777_v27 = vsel %vm695_vm1, %v776_v55, %v772_v56 }
  0xb7   : > { %v575_v33 = vpop.xlane.xlu1 %574  ;;  %v572_v34 = vpop.xlane.xlu0 %571 }
  0xb8   : > { %v722_v5 = vrot.slane %v575_v33, %v2034_v53  ;;  %v718_v3 = vrot.slane %v572_v34, %v2036_v54 }
  0xba   : > { %v723_v31 = vsel %vm695_vm1, %v722_v5, %v718_v3 }
  0xbb   : > { %v2026_v35 = vpop.xlane.xlu1 %616  ;;  %v2028_v36 = vpop.xlane.xlu0 %613  ;;  %v837_v7 = vsel %vm836_vm4, %v723_v31, %v835_v50 }
  0xbc   : > { %v785_v10 = vrot.slane %v2026_v35, %v2034_v53  ;;  %v781_v13 = vrot.slane %v2028_v36, %v2036_v54 }
  0xbe   : > { %v786_v39 = vsel %vm695_vm1, %v785_v10, %v781_v13 }
  0xbf   : > { %v581_v40 = vpop.xlane.xlu1 %580  ;;  %v578_v41 = vpop.xlane.xlu0 %577 }
  0xc0   : > { %v731_v63 = vrot.slane %v581_v40, %v2034_v53  ;;  %v727_v0 = vrot.slane %v578_v41, %v2036_v54 }
  0xc2   : > { %v732_v49 = vsel %vm695_vm1, %v731_v63, %v727_v0 }
  0xc3   : > { %v2030_v45 = vpop.xlane.xlu1 %622  ;;  %v2032_v46 = vpop.xlane.xlu0 %619  ;;  %v839_v18 = vsel %vm838_vm5, %v732_v49, %v837_v7 }
  0xc4   : > { %v794_v21 = vrot.slane %v2030_v45, %v2034_v53  ;;  %v790_v22 = vrot.slane %v2032_v46, %v2036_v54  ;;  %v768_v45 = vsel %vm695_vm1, %v767_v61, %v763_v62 }
  0xc6   : > { %v795_v46 = vsel %vm695_vm1, %v794_v21, %v790_v22 }
  0xc7   : > { %v587_v51 = vpop.xlane.xlu1 %586  ;;  %v584_v52 = vpop.xlane.xlu0 %583 }
  0xc8   : > { %v740_v25 = vrot.slane %v587_v51, %v2034_v53  ;;  %v736_v26 = vrot.slane %v584_v52, %v2036_v54  ;;  %v846_v51 = vsel %vm832_vm2, %v777_v27, %v768_v45 }
  0xca   : > { %v741_v8 = vsel %vm695_vm1, %v740_v25, %v736_v26 }
  0xcb   : > { %v2038_v57 = vpop.xlane.xlu1 %628  ;;  %v2040_v58 = vpop.xlane.xlu0 %625  ;;  %v841_v30 = vsel %vm840_vm6, %v741_v8, %v839_v18 }
  0xcc   : > { %v803_v28 = vrot.slane %v2038_v57, %v2034_v53  ;;  %v799_v29 = vrot.slane %v2040_v58, %v2036_v54  ;;  %v847_v57 = vsel %vm834_vm3, %v786_v39, %v846_v51 }
  0xcd   : > { %v848_v2 = vsel %vm836_vm4, %v795_v46, %v847_v57 }
  0xce   : > { %v804_v52 = vsel %vm695_vm1, %v803_v28, %v799_v29 }
  0xcf   : > { %v593_v11 = vpop.xlane.xlu1 %592  ;;  %v590_v12 = vpop.xlane.xlu0 %589  ;;  %v849_v4 = vsel %vm838_vm5, %v804_v52, %v848_v2 }
  0xd0   : > { %v749_v32 = vrot.slane %v593_v11, %v2034_v53  ;;  %v745_v37 = vrot.slane %v590_v12, %v2036_v54 }
  0xd2   : > { %v750_v17 = vsel %vm695_vm1, %v749_v32, %v745_v37 }
  0xd3   : > { %v635_v38 = vpop.xlane.xlu1 %634  ;;  %v632_v43 = vpop.xlane.xlu0 %631  ;;  %v843_v36 = vsel %vm842_vm7, %v750_v17, %v841_v30 }
  0xd4   : > { %v812_v33 = vrot.slane %v635_v38, %v2034_v53  ;;  %v808_v34 = vrot.slane %v632_v43, %v2036_v54 }
  0xd6   : > { %v813_v58 = vsel %vm695_vm1, %v812_v33, %v808_v34 }
  0xd7   : > { %v599_v14 = vpop.xlane.xlu1 %598  ;;  %v596_v15 = vpop.xlane.xlu0 %595  ;;  %v850_v3 = vsel %vm840_vm6, %v813_v58, %v849_v4 }
  0xd8   : > { %v758_v23 = vrot.slane %v599_v14, %v2034_v53  ;;  %v754_v24 = vrot.slane %v596_v15, %v2036_v54 }
  0xda   : > { %v759_v35 = vsel %vm695_vm1, %v758_v23, %v754_v24 }
  0xdb   : > { %v641_v40 = vpop.xlane.xlu1 %640  ;;  %v638_v41 = vpop.xlane.xlu0 %637  ;;  %v845_v42 = vsel %vm844_vm8, %v759_v35, %v843_v36 }
  0xdc   : > { %v821_v47 = vrot.slane %v641_v40, %v2034_v53  ;;  %v817_v48 = vrot.slane %v638_v41, %v2036_v54  ;;  %1588 = vmatprep.mubr.msk.f32.mxu0 %vm421_vm0, %v845_v42 }
  0xde   : > { %v822_v1 = vsel %vm695_vm1, %v821_v47, %v817_v48 }
  0xdf   : > { %v647_v59 = vpop.xlane.xlu1 %646  ;;  %v644_v60 = vpop.xlane.xlu0 %643  ;;  %v851_v12 = vsel %vm842_vm7, %v822_v1, %v850_v3 }
  0xe0   : > { %v830_v9 = vrot.slane %v647_v59, %v2034_v53  ;;  %v826_v5 = vrot.slane %v644_v60, %v2036_v54 }
  0xe2   : > { %v831_v11 = vsel %vm695_vm1, %v830_v9, %v826_v5 }
  0xe3   : > { %v427_v63 = vpop.xlane.xlu1 %426  ;;  %v424_v0 = vpop.xlane.xlu0 %423  ;;  %v852_v19 = vsel %vm844_vm8, %v831_v11, %v851_v12 }
  0xe4   : > { %1589 = vmatmul.mubr.msk.f32.vlgmr.msra.gmra.mrb[0].mxu0 %vm421_vm0, %v852_v19  ;;  %v971_v18 = vrot.slane %v427_v63, %v2034_v53  ;;  %v967_v21 = vrot.slane %v424_v0, %v2036_v54 }
  0xe5   : > { %1622 = vmatpush3.bf16.msra.mxu0 %v2015_v16 }
  0xe6   : > { %v972_v36 = vsel %vm695_vm1, %v971_v18, %v967_v21 }
  0xe7   : > { %v433_v20 = vpop.xlane.xlu1 %432  ;;  %v430_v6 = vpop.xlane.xlu0 %429 }
  0xe8   : > { %v980_v13 = vrot.slane %v433_v20, %v2034_v53  ;;  %v976_v14 = vrot.slane %v430_v6, %v2036_v54 }
  0xea   : > { %v981_v30 = vsel %vm695_vm1, %v980_v13, %v976_v14 }
  0xeb   : > { %v439_v25 = vpop.xlane.xlu1 %438  ;;  %v436_v26 = vpop.xlane.xlu0 %435  ;;  %v1108_v46 = vsel %vm832_vm2, %v981_v30, %v972_v36  ;;  %v1655_v36 = vmov 0.0|0.0  }
  0xec   : > { %v989_v15 = vrot.slane %v439_v25, %v2034_v53  ;;  %v985_v17 = vrot.slane %v436_v26, %v2036_v54 }
  0xee   : > { %v990_v33 = vsel %vm695_vm1, %v989_v15, %v985_v17 }
  0xef   : > { %v2117_v31 = vpop.xlane.xlu1 %474  ;;  %v2119_v32 = vpop.xlane.xlu0 %471  ;;  %v1109_v48 = vsel %vm834_vm3, %v990_v33, %v1108_v46 }
  0xf0   : > { %v1043_v57 = vrot.slane %v2117_v31, %v2034_v53  ;;  %v1039_v58 = vrot.slane %v2119_v32, %v2036_v54 }
  0xf3   : > { %v481_v37 = vpop.xlane.xlu1 %480  ;;  %v478_v38 = vpop.xlane.xlu0 %477 }
  0xf4   : > { %v1052_v51 = vrot.slane %v481_v37, %v2034_v53  ;;  %v1048_v52 = vrot.slane %v478_v38, %v2036_v54 }
  0xf6   : > { %v1053_v19 = vsel %vm695_vm1, %v1052_v51, %v1048_v52  ;;  %v1378_v51 = vld [vmem:[%s2231_s9] sm:$0xff] }
  0xf7   : > { %v445_v43 = vpop.xlane.xlu1 %444  ;;  %v442_v44 = vpop.xlane.xlu0 %441  ;;  %v1303_v52 = vld [vmem:[%s2230_s8] sm:$0xf] }
  0xf8   : > { %v998_v22 = vrot.slane %v445_v43, %v2034_v53  ;;  %v994_v23 = vrot.slane %v442_v44, %v2036_v54 }
  0xfa   : > { %v999_v39 = vsel %vm695_vm1, %v998_v22, %v994_v23 }
  0xfb   : > { %v487_v49 = vpop.xlane.xlu1 %486  ;;  %v484_v50 = vpop.xlane.xlu0 %483  ;;  %v1110_v2 = vsel %vm836_vm4, %v999_v39, %v1109_v48  ;;  %v1657_v39 = vmov 0.0   ;;  %v1302_v48 = vld [vmem:[%s2229_s7] sm:$0xf] }
  0xfc   : > { %v1061_v59 = vrot.slane %v487_v49, %v2034_v53  ;;  %v1057_v60 = vrot.slane %v484_v50, %v2036_v54  ;;  %v1044_v50 = vsel %vm695_vm1, %v1043_v57, %v1039_v58 }
  0xfe   : > { %v1062_v38 = vsel %vm695_vm1, %v1061_v59, %v1057_v60  ;;  %v1379_v59 = vld [vmem:[%s2231_s9 + $0x8] sm:$0xff] }
  0xff   : > { %v451_v55 = vpop.xlane.xlu1 %450  ;;  %v448_v56 = vpop.xlane.xlu0 %447  ;;  %v1381_v60 = vld [vmem:[%s2232_s10 + $0x8] sm:$0xff] }
 0x100   : > { %v1007_v28 = vrot.slane %v451_v55, %v2034_v53  ;;  %v1003_v29 = vrot.slane %v448_v56, %v2036_v54 }
 0x102   : > { %v1008_v47 = vsel %vm695_vm1, %v1007_v28, %v1003_v29  ;;  %v1212_v28 = vld [vmem:[%s2227_s5] sm:$0xff] }
 0x103   : > { %v493_v61 = vpop.xlane.xlu1 %492  ;;  %v490_v62 = vpop.xlane.xlu0 %489  ;;  %v1111_v4 = vsel %vm838_vm5, %v1008_v47, %v1110_v2  ;;  %1598 = vmatprep.subr.mxu1 %v1212_v28 }
 0x104   : > { %v1070_v11 = vrot.slane %v493_v61, %v2034_v53  ;;  %v1066_v12 = vrot.slane %v490_v62, %v2036_v54  ;;  %v1115_v62 = vsel %vm832_vm2, %v1053_v19, %v1044_v50  ;;  %1599 = vmatpush3.msra.mxu1 %v1212_v28 }
 0x105   : > { %1623 = vmatprep.subr.bf16.mxu1 %v1655_v36 }
 0x106   : > { %v1071_v55 = vsel %vm695_vm1, %v1070_v11, %v1066_v12 }
 0x107   : > { %v457_v7 = vpop.xlane.xlu1 %456  ;;  %v454_v16 = vpop.xlane.xlu0 %453 }
 0x108   : > { %v1016_v34 = vrot.slane %v457_v7, %v2034_v53  ;;  %v1012_v35 = vrot.slane %v454_v16, %v2036_v54  ;;  %v1116_v16 = vsel %vm834_vm3, %v1062_v38, %v1115_v62 }
 0x10a   : > { %v1017_v1 = vsel %vm695_vm1, %v1016_v34, %v1012_v35 }
 0x10b   : > { %v2121_v8 = vpop.xlane.xlu1 %498  ;;  %v496_v10 = vpop.xlane.xlu0 %495  ;;  %v1112_v20 = vsel %vm840_vm6, %v1017_v1, %v1111_v4  ;;  %v1380_v4 = vld [vmem:[%s2232_s10] sm:$0xff] }
 0x10c   : > { %v1079_v6 = vrot.slane %v2121_v8, %v2034_v53  ;;  %v1075_v25 = vrot.slane %v496_v10, %v2036_v54  ;;  %v1117_v10 = vsel %vm836_vm4, %v1071_v55, %v1116_v16 }
 0x10e   : > { %v1080_v7 = vsel %vm695_vm1, %v1079_v6, %v1075_v25 }
 0x10f   : > { %v463_v24 = vpop.xlane.xlu1 %462  ;;  %v460_v27 = vpop.xlane.xlu0 %459  ;;  %v1118_v17 = vsel %vm838_vm5, %v1080_v7, %v1117_v10 }
 0x110   : > { %v1025_v40 = vrot.slane %v463_v24, %v2034_v53  ;;  %v1021_v41 = vrot.slane %v460_v27, %v2036_v54 }
 0x112   : > { %v1026_v9 = vsel %vm695_vm1, %v1025_v40, %v1021_v41  ;;  %v1554_v40 = vld [vmem:[#allocation2] ss:$0 sm:$0xff] }
 0x113   : > { %v505_v42 = vpop.xlane.xlu1 %504  ;;  %v502_v45 = vpop.xlane.xlu0 %501  ;;  %v1113_v37 = vsel %vm842_vm7, %v1026_v9, %v1112_v20 }
 0x114   : > { %v1088_v26 = vrot.slane %v505_v42, %v2034_v53  ;;  %v1084_v31 = vrot.slane %v502_v45, %v2036_v54 }
 0x116   : > { %v1089_v8 = vsel %vm695_vm1, %v1088_v26, %v1084_v31 }
 0x117   : > { %v469_v5 = vpop.xlane.xlu1 %468  ;;  %v466_v3 = vpop.xlane.xlu0 %465  ;;  %v1119_v22 = vsel %vm840_vm6, %v1089_v8, %v1118_v17 }
 0x118   : > { %v1034_v63 = vrot.slane %v469_v5, %v2034_v53  ;;  %v1030_v0 = vrot.slane %v466_v3, %v2036_v54 }
 0x11a   : > { %v1035_v32 = vsel %vm695_vm1, %v1034_v63, %v1030_v0 }
 0x11b   : > { %v511_v43 = vpop.xlane.xlu1 %510  ;;  %v508_v44 = vpop.xlane.xlu0 %507  ;;  %v1114_v49 = vsel %vm844_vm8, %v1035_v32, %v1113_v37 }
 0x11c   : > { %v1097_v56 = vrot.slane %v511_v43, %v2034_v53  ;;  %v1093_v61 = vrot.slane %v508_v44, %v2036_v54  ;;  %1595 = vmatprep.mubr.msk.f32.mxu0 %vm421_vm0, %v1114_v49 }
 0x11e   : > { %v1098_v13 = vsel %vm695_vm1, %v1097_v56, %v1093_v61 }
 0x11f   : > { %v517_v14 = vpop.xlane.xlu1 %516  ;;  %v514_v15 = vpop.xlane.xlu0 %513  ;;  %v1120_v23 = vsel %vm842_vm7, %v1098_v13, %v1119_v22 }
 0x120   : > { %v1106_v18 = vrot.slane %v517_v14, %v2034_v53  ;;  %v1102_v21 = vrot.slane %v514_v15, %v2036_v54  ;;  %v1553_v53 = vld [vmem:[%s2226_s4] ss:$0 sm:$0xff] }
 0x122   : > { %v1107_v24 = vsel %vm695_vm1, %v1106_v18, %v1102_v21 }
 0x123   : > { %v1121_v27 = vsel %vm844_vm8, %v1107_v24, %v1120_v23 }
 0x124   : > { %1596 = vmatmul.mubr.msk.f32.vlgmr.msra.gmra.mrb[0].mxu0 %vm421_vm0, %v1121_v27 }
 0x1f7   : > { %v1597_v54 = vpop.f32.mrb[0].mxu0 }
 0x1f8   : > { %v1209_v29 = vadd.f32 %v1597_v54, %v1553_v53  ;;  %v1192_v30 = vpop.f32.mrb[1].mxu0 }
 0x1f9   : > { %v1208_v33 = vadd.f32 %v1553_v53, %v1192_v30 }
 0x1fa   : > { %v1211_v35 = vmax.f32 %v1209_v29, 0.0 }
 0x1fb   : > { %v1210_v34 = vmax.f32 %v1208_v33, 0.0 }
 0x1fd   : > { %1600 = vmatprep.mubr.msk.f32.mxu1 %vm1220_vm9, %v1210_v34 }
 0x1fe   : > { %1601 = vmatmul.mubr.msk.f32.vlgmr.msra.gmra.mrb[0].mxu1 %vm1220_vm9, %v1211_v35 }
 0x1ff   : > { %1607 = vmatprep.mubr.msk.f32.mxu1 %vm1656_vm10, %v1657_v39 }
 0x2d1   : > { %v1602_v41 = vpop.f32.mrb[0].mxu1 }
 0x2d2   : > { %v1299_v42 = vadd.f32 %v1602_v41, %v1554_v40  ;;  %v1293_v45 = vpop.f32.mrb[1].mxu1 }
 0x2d3   : > { %v1294_v46 = vadd.f32 %v1554_v40, %v1293_v45 }
 0x2d5   : > { %v1624_v47 = vpack.c.bf16 %v1299_v42, %v1294_v46 }
 0x2d7   : > { %1625 = vmatpush3.bf16.msra.mxu1 %v1624_v47 }
 0x2da   : > { %1608 = vmatmul.mubr.msk.f32.vlgmr.msra.gmra.mrb[2].mxu1 %vm421_vm0, %v1302_v48 }
 0x2db   : > { %1612 = vmatprep.mubr.msk.f32.mxu1 %vm1382_vm11, %v1378_v51 }
 0x3ad   : > { %v1373_v57 = vpop.f32.mrb[2].mxu1 }
 0x3ae   : > { %v1374_v58 = vadd.f32 %v1373_v57, %v1303_v52  ;;  %v1609_v2 = vpop.f32.mrb[3].mxu1 }
 0x3b0   : > { %v1377_v1 = vmax.f32 %v1374_v58, 0.0 }
 0x3b2   : > { %1610 = vmatprep.subr.msk.mxu1 %vm1389_vm12, %v1377_v1 }
 0x3b3   : > { %1611 = vmatpush3.msk.msra.mxu1 %vm1389_vm12, %v1377_v1 }
 0x3b4   : > { %1613 = vmatmul.mubr.msk.f32.vlgmr.msra.gmra.mrb[4].mxu1 %vm1382_vm11, %v1379_v59 }
 0x487   : > { %v1614_v9 = vpop.f32.mrb[4].mxu1 }
 0x488   : > { %v1465_v5 = vadd.f32 %v1614_v9, %v1381_v60  ;;  %v1459_v3 = vpop.f32.mrb[5].mxu1 }
 0x489   : > { %v1460_v11 = vadd.f32 %v1459_v3, %v1380_v4 }
 0x48a   : > { %v1562_v12 = vmul.f32 -1.442695, %v1465_v5 }
 0x48b   : > { %v1561_v63 = vmul.f32 -1.442695, %v1460_v11 }
 0x48c   : > { %1639 = vpow2.f32 %v1562_v12 }
 0x48d   : > { %1641 = vpow2.f32 %v1561_v63 }
 0x496   : > { %v1640_v0 = vpop.eup %1639 }
 0x497   : > { %v1642_v19 = vpop.eup %1641  ;;  %v1475_v20 = vadd.f32 1.0, %v1640_v0 }
 0x498   : > { %v1474_v6 = vadd.f32 1.0, %v1642_v19 }
 0x499   : > { %1643 = vrcp.f32 %v1475_v20 }
 0x49a   : > { %1645 = vrcp.f32 %v1474_v6 }
 0x4a3   : > { %v1644_v25 = vpop.eup %1643 }
 0x4a4   : > { %v1646_v26 = vpop.eup %1645  ;;  %v1481_v31 = vadd.f32 1.0, %v1644_v25 }
 0x4a5   : > { %v1480_v32 = vadd.f32 1.0, %v1646_v26 }
 0x4a6   : > { %1484 = vst.msk [vmem:[%s388_s18 + $0x8] sm:$0xff] %vm1482_vm13, %v1481_v31 }
 0x4a7   : > { %1483 = vst.msk [vmem:[%s388_s18] sm:$0xff] %vm1482_vm13, %v1480_v32 }
 0x4a8 PF: > { %s23_s19 = sadd.s32 1, %s1653_s19  }
 0x4a9   : > { %p20_p4 = scmp.ge.s32.totalorder %s23_s19, 4  }
 0x4ab   :  { %22 = sbr.rel (!%p20_p4) target bundleno = 3 (0x3), region = 94 }

</bundles_post_ra>
